<compile_context>
chip_gen: v7x
topology: tpu7x:2x2x1
jax: 0.10.0
libtpu: 0.0.40
codegen_flags: <defaults>
</compile_context>

<pallas_src>
import math

import jax
import jax.numpy as jnp
from jax.experimental import pallas as pl
from jax.experimental.pallas import tpu as pltpu


def _mha_kernel(seq, embed, num_heads, head_dim):
    """One grid step == one batch element."""

    def kernel(xq_ref, xk_ref, xv_ref,
               wq_ref, wk_ref, wv_ref,
               bq_ref, bk_ref, bv_ref,
               wo_ref, bo_ref,
               o_ref, vals_ref):
        # xq/xk/xv_ref: (1, S, E) f32   activations for this batch element
        # wq/wk/wv_ref: (E, E)    bf16  (Wq already carries 1/sqrt(head_dim))
        # bq/bk/bv_ref: (1, E)    f32   (bq already carries 1/sqrt(head_dim))
        # wo_ref:       (E, E)    bf16
        # bo_ref:       (1, E)    f32
        # o_ref:        (1, S, E)
        # vals_ref:     (S, E)    f32 VMEM scratch (concatenated head outputs)

        xq = xq_ref[0].astype(jnp.bfloat16)          # (S, E) bf16 MXU operand
        xk = xk_ref[0].astype(jnp.bfloat16)
        xv = xv_ref[0].astype(jnp.bfloat16)

        # Q/K/V projections: bf16 operands, f32 accumulation, f32 bias add.
        q = jnp.dot(xq, wq_ref[...], preferred_element_type=jnp.float32) + bq_ref[...]
        k = jnp.dot(xk, wk_ref[...], preferred_element_type=jnp.float32) + bk_ref[...]
        v = jnp.dot(xv, wv_ref[...], preferred_element_type=jnp.float32) + bv_ref[...]

        qb = q.astype(jnp.bfloat16)                  # bf16 copies for the MXU
        kb = k.astype(jnp.bfloat16)
        vb = v.astype(jnp.bfloat16)

        # Static unroll over heads; softmax stays f32.
        for h in range(num_heads):
            lo = h * head_dim
            qh = qb[:, lo:lo + head_dim]             # (S, hd) bf16
            kh = kb[:, lo:lo + head_dim]
            vh = vb[:, lo:lo + head_dim]

            # logits already carry the 1/sqrt(head_dim) scale via Wq/bq.
            logits = jnp.einsum("qd,kd->qk", qh, kh,
                                preferred_element_type=jnp.float32)   # (S, S) f32
            m = jnp.max(logits, axis=-1, keepdims=True)
            p = jnp.exp(logits - m)
            denom = jnp.sum(p, axis=-1, keepdims=True)
            attn = (p * pl.reciprocal(denom, approx=True)).astype(jnp.bfloat16)

            ctx = jnp.dot(attn, vh, preferred_element_type=jnp.float32)  # (S, hd)
            vals_ref[:, lo:lo + head_dim] = ctx      # assemble (S, E) values slab

        # Single output projection, contraction depth K = E (not head_dim).
        out = jnp.dot(vals_ref[...].astype(jnp.bfloat16), wo_ref[...],
                      preferred_element_type=jnp.float32) + bo_ref[...]
        o_ref[0] = out.astype(o_ref.dtype)

    return kernel


def custom_multihead_attention(query, key, value, params, num_heads):
    """query/key/value: (B, S, E) float32.

    params: dict with (E, E) weights stored as (in, out) (= W.T of nn.Linear)
    and (E,) biases, all float32.
    """
    B, S, E = query.shape
    assert E % num_heads == 0
    head_dim = E // num_heads
    scale = 1.0 / math.sqrt(head_dim)

    # Host-side packing: fold the attention scale into the Q projection and
    # pre-cast all matmul weights to bf16 (halves weight DMA + VMEM, feeds the
    # MXU at its native rate).  Biases stay f32 (added after f32 accumulation).
    wq = (params["wq"] * scale).astype(jnp.bfloat16)
    wk = params["wk"].astype(jnp.bfloat16)
    wv = params["wv"].astype(jnp.bfloat16)
    wo = params["wo"].astype(jnp.bfloat16)
    bq = (params["bq"] * scale).reshape(1, E)
    bk = params["bk"].reshape(1, E)
    bv = params["bv"].reshape(1, E)
    bo = params["bo"].reshape(1, E)

    x_spec = pl.BlockSpec((1, S, E), lambda b: (b, 0, 0))   # blocked over batch
    w_spec = pl.BlockSpec((E, E), lambda b: (0, 0))         # resident weights
    b_spec = pl.BlockSpec((1, E), lambda b: (0, 0))         # resident biases

    out = pl.pallas_call(
        _mha_kernel(S, E, num_heads, head_dim),
        out_shape=jax.ShapeDtypeStruct((B, S, E), query.dtype),
        grid=(B,),                                          # >=2 steps: overlap + v7x 2 TCs
        in_specs=[x_spec, x_spec, x_spec,
                  w_spec, w_spec, w_spec,
                  b_spec, b_spec, b_spec,
                  w_spec, b_spec],
        out_specs=pl.BlockSpec((1, S, E), lambda b: (b, 0, 0)),
        scratch_shapes=[pltpu.VMEM((S, E), jnp.float32)],
        compiler_params=pltpu.CompilerParams(
            dimension_semantics=("parallel",),
            # Above the 16/32 MiB scoped defaults, below v7x's 64 MiB physical.
            vmem_limit_bytes=48 * 1024 * 1024),
    )(query, key, value, wq, wk, wv, bq, bk, bv, wo, bo)
    return out


def _reference(query, key, value, params, num_heads):
    """Pure-JAX f32 reference matching the PyTorch module semantics."""
    B, S, E = query.shape
    hd = E // num_heads
    q = query @ params["wq"] + params["bq"]
    k = key @ params["wk"] + params["bk"]
    v = value @ params["wv"] + params["bv"]
    q = q.reshape(B, S, num_heads, hd).transpose(0, 2, 1, 3)
    k = k.reshape(B, S, num_heads, hd).transpose(0, 2, 1, 3)
    v = v.reshape(B, S, num_heads, hd).transpose(0, 2, 1, 3)
    logits = jnp.einsum("bhsd,bhtd->bhst", q, k) / math.sqrt(hd)
    attn = jax.nn.softmax(logits, axis=-1)
    vals = jnp.einsum("bhst,bhtd->bhsd", attn, v)
    vals = vals.transpose(0, 2, 1, 3).reshape(B, S, E)
    return vals @ params["wo"] + params["bo"]


if __name__ == "__main__":
    B, S, E = 2, 8, 32
    num_heads = 4

    key_root = jax.random.PRNGKey(0)
    keys = jax.random.split(key_root, 12)

    # Deterministic parameter init (weights stored as (in, out), i.e. W.T of nn.Linear).
    bound = 1.0 / math.sqrt(E)
    params = {
        "wq": jax.random.uniform(keys[0], (E, E), jnp.float32, -bound, bound),
        "bq": jax.random.uniform(keys[1], (E,), jnp.float32, -bound, bound),
        "wk": jax.random.uniform(keys[2], (E, E), jnp.float32, -bound, bound),
        "bk": jax.random.uniform(keys[3], (E,), jnp.float32, -bound, bound),
        "wv": jax.random.uniform(keys[4], (E, E), jnp.float32, -bound, bound),
        "bv": jax.random.uniform(keys[5], (E,), jnp.float32, -bound, bound),
        "wo": jax.random.uniform(keys[6], (E, E), jnp.float32, -bound, bound),
        "bo": jax.random.uniform(keys[7], (E,), jnp.float32, -bound, bound),
    }

    query = jax.random.normal(keys[8], (B, S, E), jnp.float32)
    key_in = jax.random.normal(keys[9], (B, S, E), jnp.float32)
    value = jax.random.normal(keys[10], (B, S, E), jnp.float32)

    out = custom_multihead_attention(query, key_in, value, params, num_heads)
    out = jax.block_until_ready(out)

    ref = _reference(query, key_in, value, params, num_heads)
    assert out.shape == (B, S, E)
    # Tolerance covers bf16 MXU operands (f32 accumulation) plus the
    # approximate EUP reciprocal in the softmax; the f32 reference matches to
    # a few 1e-2 absolute — structural bugs would be orders of magnitude larger.
    max_err = float(jnp.max(jnp.abs(out - ref)))
    assert jnp.allclose(out, ref, atol=5e-2, rtol=5e-2), (
        f"mismatch vs reference, max abs err {max_err}")

    print("KERNEL_OK")
</pallas_src>

<mosaic_0001>
module attributes {stable_mosaic.version = 11 : i64} {
  func.func @kernel(%arg0: i32, %arg1: memref<1x8x32xf32, #tpu.memory_space<vmem>>, %arg2: memref<1x8x32xf32, #tpu.memory_space<vmem>>, %arg3: memref<1x8x32xf32, #tpu.memory_space<vmem>>, %arg4: memref<32x32xbf16, #tpu.memory_space<vmem>>, %arg5: memref<32x32xbf16, #tpu.memory_space<vmem>>, %arg6: memref<32x32xbf16, #tpu.memory_space<vmem>>, %arg7: memref<1x32xf32, #tpu.memory_space<vmem>>, %arg8: memref<1x32xf32, #tpu.memory_space<vmem>>, %arg9: memref<1x32xf32, #tpu.memory_space<vmem>>, %arg10: memref<32x32xbf16, #tpu.memory_space<vmem>>, %arg11: memref<1x32xf32, #tpu.memory_space<vmem>>, %arg12: memref<1x8x32xf32, #tpu.memory_space<vmem>>, %arg13: memref<8x32xf32, #tpu.memory_space<vmem>>) attributes {dimension_semantics = [#tpu.dimension_semantics<parallel>], iteration_bounds = array<i64: 2>, scalar_prefetch = 0 : i64, scratch_operands = 1 : i64, tpu.core_type = #tpu.core_type<tc>, window_params = [{transform_indices = @transform_0, window_bounds = array<i64: 1, 8, 32>}, {transform_indices = @transform_1, window_bounds = array<i64: 1, 8, 32>}, {transform_indices = @transform_2, window_bounds = array<i64: 1, 8, 32>}, {pipeline_mode = #tpu.pipeline_mode<synchronous>, transform_indices = @transform_3, window_bounds = array<i64: 32, 32>}, {pipeline_mode = #tpu.pipeline_mode<synchronous>, transform_indices = @transform_4, window_bounds = array<i64: 32, 32>}, {pipeline_mode = #tpu.pipeline_mode<synchronous>, transform_indices = @transform_5, window_bounds = array<i64: 32, 32>}, {pipeline_mode = #tpu.pipeline_mode<synchronous>, transform_indices = @transform_6, window_bounds = array<i64: 1, 32>}, {pipeline_mode = #tpu.pipeline_mode<synchronous>, transform_indices = @transform_7, window_bounds = array<i64: 1, 32>}, {pipeline_mode = #tpu.pipeline_mode<synchronous>, transform_indices = @transform_8, window_bounds = array<i64: 1, 32>}, {pipeline_mode = #tpu.pipeline_mode<synchronous>, transform_indices = @transform_9, window_bounds = array<i64: 32, 32>}, {pipeline_mode = #tpu.pipeline_mode<synchronous>, transform_indices = @transform_10, window_bounds = array<i64: 1, 32>}, {transform_indices = @transform_11, window_bounds = array<i64: 1, 8, 32>}]} {
    %c0 = arith.constant 0 : index
    %c0_0 = arith.constant 0 : index
    %c0_1 = arith.constant 0 : index
    %0 = vector.load %arg1[%c0, %c0_0, %c0_1] : memref<1x8x32xf32, #tpu.memory_space<vmem>>, vector<1x8x32xf32>
    %1 = vector.shape_cast %0 : vector<1x8x32xf32> to vector<8x32xf32>
    %2 = arith.truncf %1 : vector<8x32xf32> to vector<8x32xbf16>
    %c0_2 = arith.constant 0 : index
    %c0_3 = arith.constant 0 : index
    %c0_4 = arith.constant 0 : index
    %3 = vector.load %arg2[%c0_2, %c0_3, %c0_4] : memref<1x8x32xf32, #tpu.memory_space<vmem>>, vector<1x8x32xf32>
    %4 = vector.shape_cast %3 : vector<1x8x32xf32> to vector<8x32xf32>
    %5 = arith.truncf %4 : vector<8x32xf32> to vector<8x32xbf16>
    %c0_5 = arith.constant 0 : index
    %c0_6 = arith.constant 0 : index
    %c0_7 = arith.constant 0 : index
    %6 = vector.load %arg3[%c0_5, %c0_6, %c0_7] : memref<1x8x32xf32, #tpu.memory_space<vmem>>, vector<1x8x32xf32>
    %7 = vector.shape_cast %6 : vector<1x8x32xf32> to vector<8x32xf32>
    %8 = arith.truncf %7 : vector<8x32xf32> to vector<8x32xbf16>
    %c0_8 = arith.constant 0 : index
    %c0_9 = arith.constant 0 : index
    %9 = vector.load %arg4[%c0_8, %c0_9] : memref<32x32xbf16, #tpu.memory_space<vmem>>, vector<32x32xbf16>
    %cst = arith.constant dense<0.000000e+00> : vector<8x32xf32>
    %10 = tpu.matmul %2, %9, %cst {dimension_numbers = #tpu.dot_dimension_numbers<[1], [0], [0], [1], [0, 0, 1, 1], [], []>} : vector<8x32xbf16>, vector<32x32xbf16>, vector<8x32xf32> -> vector<8x32xf32>
    %c0_10 = arith.constant 0 : index
    %c0_11 = arith.constant 0 : index
    %11 = vector.load %arg7[%c0_10, %c0_11] : memref<1x32xf32, #tpu.memory_space<vmem>>, vector<1x32xf32>
    %12 = vector.broadcast %11 : vector<1x32xf32> to vector<8x32xf32>
    %13 = arith.addf %10, %12 : vector<8x32xf32>
    %c0_12 = arith.constant 0 : index
    %c0_13 = arith.constant 0 : index
    %14 = vector.load %arg5[%c0_12, %c0_13] : memref<32x32xbf16, #tpu.memory_space<vmem>>, vector<32x32xbf16>
    %cst_14 = arith.constant dense<0.000000e+00> : vector<8x32xf32>
    %15 = tpu.matmul %5, %14, %cst_14 {dimension_numbers = #tpu.dot_dimension_numbers<[1], [0], [0], [1], [0, 0, 1, 1], [], []>} : vector<8x32xbf16>, vector<32x32xbf16>, vector<8x32xf32> -> vector<8x32xf32>
    %c0_15 = arith.constant 0 : index
    %c0_16 = arith.constant 0 : index
    %16 = vector.load %arg8[%c0_15, %c0_16] : memref<1x32xf32, #tpu.memory_space<vmem>>, vector<1x32xf32>
    %17 = vector.broadcast %16 : vector<1x32xf32> to vector<8x32xf32>
    %18 = arith.addf %15, %17 : vector<8x32xf32>
    %c0_17 = arith.constant 0 : index
    %c0_18 = arith.constant 0 : index
    %19 = vector.load %arg6[%c0_17, %c0_18] : memref<32x32xbf16, #tpu.memory_space<vmem>>, vector<32x32xbf16>
    %cst_19 = arith.constant dense<0.000000e+00> : vector<8x32xf32>
    %20 = tpu.matmul %8, %19, %cst_19 {dimension_numbers = #tpu.dot_dimension_numbers<[1], [0], [0], [1], [0, 0, 1, 1], [], []>} : vector<8x32xbf16>, vector<32x32xbf16>, vector<8x32xf32> -> vector<8x32xf32>
    %c0_20 = arith.constant 0 : index
    %c0_21 = arith.constant 0 : index
    %21 = vector.load %arg9[%c0_20, %c0_21] : memref<1x32xf32, #tpu.memory_space<vmem>>, vector<1x32xf32>
    %22 = vector.broadcast %21 : vector<1x32xf32> to vector<8x32xf32>
    %23 = arith.addf %20, %22 : vector<8x32xf32>
    %24 = arith.truncf %13 : vector<8x32xf32> to vector<8x32xbf16>
    %25 = arith.truncf %18 : vector<8x32xf32> to vector<8x32xbf16>
    %26 = arith.truncf %23 : vector<8x32xf32> to vector<8x32xbf16>
    %27 = vector.extract_strided_slice %24 {offsets = [0, 0], sizes = [8, 8], strides = [1, 1]} : vector<8x32xbf16> to vector<8x8xbf16>
    %28 = vector.extract_strided_slice %25 {offsets = [0, 0], sizes = [8, 8], strides = [1, 1]} : vector<8x32xbf16> to vector<8x8xbf16>
    %29 = vector.extract_strided_slice %26 {offsets = [0, 0], sizes = [8, 8], strides = [1, 1]} : vector<8x32xbf16> to vector<8x8xbf16>
    "tpu.trace_start"() <{level = 10 : i32, message = "qd,kd->qk"}> : () -> ()
    %cst_22 = arith.constant dense<0.000000e+00> : vector<8x8xf32>
    %30 = tpu.matmul %27, %28, %cst_22 {dimension_numbers = #tpu.dot_dimension_numbers<[1], [1], [0], [0], [0, 0, 1, 0], [], []>} : vector<8x8xbf16>, vector<8x8xbf16>, vector<8x8xf32> -> vector<8x8xf32>
    "tpu.trace_stop"() : () -> ()
    %cst_23 = arith.constant dense<0xFF800000> : vector<8xf32>
    %31 = vector.multi_reduction <maximumf>, %30, %cst_23 [1] : vector<8x8xf32> to vector<8xf32>
    %32 = vector.shape_cast %31 : vector<8xf32> to vector<8x1xf32>
    %33 = vector.broadcast %32 : vector<8x1xf32> to vector<8x8xf32>
    %34 = arith.subf %30, %33 : vector<8x8xf32>
    %35 = math.exp %34 : vector<8x8xf32>
    %cst_24 = arith.constant dense<0.000000e+00> : vector<8xf32>
    %36 = vector.multi_reduction <add>, %35, %cst_24 [1] : vector<8x8xf32> to vector<8xf32>
    %37 = vector.shape_cast %36 : vector<8xf32> to vector<8x1xf32>
    %38 = tpu.reciprocal %37 {approx = true} : vector<8x1xf32> -> vector<8x1xf32>
    %39 = vector.broadcast %38 : vector<8x1xf32> to vector<8x8xf32>
    %40 = arith.mulf %35, %39 : vector<8x8xf32>
    %41 = arith.truncf %40 : vector<8x8xf32> to vector<8x8xbf16>
    %cst_25 = arith.constant dense<0.000000e+00> : vector<8x8xf32>
    %42 = tpu.matmul %41, %29, %cst_25 {dimension_numbers = #tpu.dot_dimension_numbers<[1], [0], [0], [1], [0, 0, 1, 1], [], []>} : vector<8x8xbf16>, vector<8x8xbf16>, vector<8x8xf32> -> vector<8x8xf32>
    %c0_26 = arith.constant 0 : index
    %c0_27 = arith.constant 0 : index
    %43 = vector.load %arg13[%c0_26, %c0_27] : memref<8x32xf32, #tpu.memory_space<vmem>>, vector<8x8xf32>
    tpu.vector_store %arg13[%c0_26, %c0_27], %42 {strides = array<i32>} : memref<8x32xf32, #tpu.memory_space<vmem>>, vector<8x8xf32>,
    %44 = vector.extract_strided_slice %24 {offsets = [0, 8], sizes = [8, 8], strides = [1, 1]} : vector<8x32xbf16> to vector<8x8xbf16>
    %45 = vector.extract_strided_slice %25 {offsets = [0, 8], sizes = [8, 8], strides = [1, 1]} : vector<8x32xbf16> to vector<8x8xbf16>
    %46 = vector.extract_strided_slice %26 {offsets = [0, 8], sizes = [8, 8], strides = [1, 1]} : vector<8x32xbf16> to vector<8x8xbf16>
    "tpu.trace_start"() <{level = 10 : i32, message = "qd,kd->qk"}> : () -> ()
    %cst_28 = arith.constant dense<0.000000e+00> : vector<8x8xf32>
    %47 = tpu.matmul %44, %45, %cst_28 {dimension_numbers = #tpu.dot_dimension_numbers<[1], [1], [0], [0], [0, 0, 1, 0], [], []>} : vector<8x8xbf16>, vector<8x8xbf16>, vector<8x8xf32> -> vector<8x8xf32>
    "tpu.trace_stop"() : () -> ()
    %cst_29 = arith.constant dense<0xFF800000> : vector<8xf32>
    %48 = vector.multi_reduction <maximumf>, %47, %cst_29 [1] : vector<8x8xf32> to vector<8xf32>
    %49 = vector.shape_cast %48 : vector<8xf32> to vector<8x1xf32>
    %50 = vector.broadcast %49 : vector<8x1xf32> to vector<8x8xf32>
    %51 = arith.subf %47, %50 : vector<8x8xf32>
    %52 = math.exp %51 : vector<8x8xf32>
    %cst_30 = arith.constant dense<0.000000e+00> : vector<8xf32>
    %53 = vector.multi_reduction <add>, %52, %cst_30 [1] : vector<8x8xf32> to vector<8xf32>
    %54 = vector.shape_cast %53 : vector<8xf32> to vector<8x1xf32>
    %55 = tpu.reciprocal %54 {approx = true} : vector<8x1xf32> -> vector<8x1xf32>
    %56 = vector.broadcast %55 : vector<8x1xf32> to vector<8x8xf32>
    %57 = arith.mulf %52, %56 : vector<8x8xf32>
    %58 = arith.truncf %57 : vector<8x8xf32> to vector<8x8xbf16>
    %cst_31 = arith.constant dense<0.000000e+00> : vector<8x8xf32>
    %59 = tpu.matmul %58, %46, %cst_31 {dimension_numbers = #tpu.dot_dimension_numbers<[1], [0], [0], [1], [0, 0, 1, 1], [], []>} : vector<8x8xbf16>, vector<8x8xbf16>, vector<8x8xf32> -> vector<8x8xf32>
    %c0_32 = arith.constant 0 : index
    %c8 = arith.constant 8 : index
    %60 = vector.load %arg13[%c0_32, %c8] : memref<8x32xf32, #tpu.memory_space<vmem>>, vector<8x8xf32>
    tpu.vector_store %arg13[%c0_32, %c8], %59 {strides = array<i32>} : memref<8x32xf32, #tpu.memory_space<vmem>>, vector<8x8xf32>,
    %61 = vector.extract_strided_slice %24 {offsets = [0, 16], sizes = [8, 8], strides = [1, 1]} : vector<8x32xbf16> to vector<8x8xbf16>
    %62 = vector.extract_strided_slice %25 {offsets = [0, 16], sizes = [8, 8], strides = [1, 1]} : vector<8x32xbf16> to vector<8x8xbf16>
    %63 = vector.extract_strided_slice %26 {offsets = [0, 16], sizes = [8, 8], strides = [1, 1]} : vector<8x32xbf16> to vector<8x8xbf16>
    "tpu.trace_start"() <{level = 10 : i32, message = "qd,kd->qk"}> : () -> ()
    %cst_33 = arith.constant dense<0.000000e+00> : vector<8x8xf32>
    %64 = tpu.matmul %61, %62, %cst_33 {dimension_numbers = #tpu.dot_dimension_numbers<[1], [1], [0], [0], [0, 0, 1, 0], [], []>} : vector<8x8xbf16>, vector<8x8xbf16>, vector<8x8xf32> -> vector<8x8xf32>
    "tpu.trace_stop"() : () -> ()
    %cst_34 = arith.constant dense<0xFF800000> : vector<8xf32>
    %65 = vector.multi_reduction <maximumf>, %64, %cst_34 [1] : vector<8x8xf32> to vector<8xf32>
    %66 = vector.shape_cast %65 : vector<8xf32> to vector<8x1xf32>
    %67 = vector.broadcast %66 : vector<8x1xf32> to vector<8x8xf32>
    %68 = arith.subf %64, %67 : vector<8x8xf32>
    %69 = math.exp %68 : vector<8x8xf32>
    %cst_35 = arith.constant dense<0.000000e+00> : vector<8xf32>
    %70 = vector.multi_reduction <add>, %69, %cst_35 [1] : vector<8x8xf32> to vector<8xf32>
    %71 = vector.shape_cast %70 : vector<8xf32> to vector<8x1xf32>
    %72 = tpu.reciprocal %71 {approx = true} : vector<8x1xf32> -> vector<8x1xf32>
    %73 = vector.broadcast %72 : vector<8x1xf32> to vector<8x8xf32>
    %74 = arith.mulf %69, %73 : vector<8x8xf32>
    %75 = arith.truncf %74 : vector<8x8xf32> to vector<8x8xbf16>
    %cst_36 = arith.constant dense<0.000000e+00> : vector<8x8xf32>
    %76 = tpu.matmul %75, %63, %cst_36 {dimension_numbers = #tpu.dot_dimension_numbers<[1], [0], [0], [1], [0, 0, 1, 1], [], []>} : vector<8x8xbf16>, vector<8x8xbf16>, vector<8x8xf32> -> vector<8x8xf32>
    %c0_37 = arith.constant 0 : index
    %c16 = arith.constant 16 : index
    %77 = vector.load %arg13[%c0_37, %c16] : memref<8x32xf32, #tpu.memory_space<vmem>>, vector<8x8xf32>
    tpu.vector_store %arg13[%c0_37, %c16], %76 {strides = array<i32>} : memref<8x32xf32, #tpu.memory_space<vmem>>, vector<8x8xf32>,
    %78 = vector.extract_strided_slice %24 {offsets = [0, 24], sizes = [8, 8], strides = [1, 1]} : vector<8x32xbf16> to vector<8x8xbf16>
    %79 = vector.extract_strided_slice %25 {offsets = [0, 24], sizes = [8, 8], strides = [1, 1]} : vector<8x32xbf16> to vector<8x8xbf16>
    %80 = vector.extract_strided_slice %26 {offsets = [0, 24], sizes = [8, 8], strides = [1, 1]} : vector<8x32xbf16> to vector<8x8xbf16>
    "tpu.trace_start"() <{level = 10 : i32, message = "qd,kd->qk"}> : () -> ()
    %cst_38 = arith.constant dense<0.000000e+00> : vector<8x8xf32>
    %81 = tpu.matmul %78, %79, %cst_38 {dimension_numbers = #tpu.dot_dimension_numbers<[1], [1], [0], [0], [0, 0, 1, 0], [], []>} : vector<8x8xbf16>, vector<8x8xbf16>, vector<8x8xf32> -> vector<8x8xf32>
    "tpu.trace_stop"() : () -> ()
    %cst_39 = arith.constant dense<0xFF800000> : vector<8xf32>
    %82 = vector.multi_reduction <maximumf>, %81, %cst_39 [1] : vector<8x8xf32> to vector<8xf32>
    %83 = vector.shape_cast %82 : vector<8xf32> to vector<8x1xf32>
    %84 = vector.broadcast %83 : vector<8x1xf32> to vector<8x8xf32>
    %85 = arith.subf %81, %84 : vector<8x8xf32>
    %86 = math.exp %85 : vector<8x8xf32>
    %cst_40 = arith.constant dense<0.000000e+00> : vector<8xf32>
    %87 = vector.multi_reduction <add>, %86, %cst_40 [1] : vector<8x8xf32> to vector<8xf32>
    %88 = vector.shape_cast %87 : vector<8xf32> to vector<8x1xf32>
    %89 = tpu.reciprocal %88 {approx = true} : vector<8x1xf32> -> vector<8x1xf32>
    %90 = vector.broadcast %89 : vector<8x1xf32> to vector<8x8xf32>
    %91 = arith.mulf %86, %90 : vector<8x8xf32>
    %92 = arith.truncf %91 : vector<8x8xf32> to vector<8x8xbf16>
    %cst_41 = arith.constant dense<0.000000e+00> : vector<8x8xf32>
    %93 = tpu.matmul %92, %80, %cst_41 {dimension_numbers = #tpu.dot_dimension_numbers<[1], [0], [0], [1], [0, 0, 1, 1], [], []>} : vector<8x8xbf16>, vector<8x8xbf16>, vector<8x8xf32> -> vector<8x8xf32>
    %c0_42 = arith.constant 0 : index
    %c24 = arith.constant 24 : index
    %94 = vector.load %arg13[%c0_42, %c24] : memref<8x32xf32, #tpu.memory_space<vmem>>, vector<8x8xf32>
    tpu.vector_store %arg13[%c0_42, %c24], %93 {strides = array<i32>} : memref<8x32xf32, #tpu.memory_space<vmem>>, vector<8x8xf32>,
    %c0_43 = arith.constant 0 : index
    %c0_44 = arith.constant 0 : index
    %95 = vector.load %arg13[%c0_43, %c0_44] : memref<8x32xf32, #tpu.memory_space<vmem>>, vector<8x32xf32>
    %96 = arith.truncf %95 : vector<8x32xf32> to vector<8x32xbf16>
    %c0_45 = arith.constant 0 : index
    %c0_46 = arith.constant 0 : index
    %97 = vector.load %arg10[%c0_45, %c0_46] : memref<32x32xbf16, #tpu.memory_space<vmem>>, vector<32x32xbf16>
    %cst_47 = arith.constant dense<0.000000e+00> : vector<8x32xf32>
    %98 = tpu.matmul %96, %97, %cst_47 {dimension_numbers = #tpu.dot_dimension_numbers<[1], [0], [0], [1], [0, 0, 1, 1], [], []>} : vector<8x32xbf16>, vector<32x32xbf16>, vector<8x32xf32> -> vector<8x32xf32>
    %c0_48 = arith.constant 0 : index
    %c0_49 = arith.constant 0 : index
    %99 = vector.load %arg11[%c0_48, %c0_49] : memref<1x32xf32, #tpu.memory_space<vmem>>, vector<1x32xf32>
    %100 = vector.broadcast %99 : vector<1x32xf32> to vector<8x32xf32>
    %101 = arith.addf %98, %100 : vector<8x32xf32>
    %c0_50 = arith.constant 0 : index
    %c0_51 = arith.constant 0 : index
    %c0_52 = arith.constant 0 : index
    %102 = vector.load %arg12[%c0_50, %c0_51, %c0_52] : memref<1x8x32xf32, #tpu.memory_space<vmem>>, vector<1x8x32xf32>
    %103 = vector.shape_cast %102 : vector<1x8x32xf32> to vector<8x32xf32>
    %104 = vector.shape_cast %101 : vector<8x32xf32> to vector<1x8x32xf32>
    tpu.vector_store %arg12[%c0_50, %c0_51, %c0_52], %104 {strides = array<i32>} : memref<1x8x32xf32, #tpu.memory_space<vmem>>, vector<1x8x32xf32>,
    return
  }
  func.func @transform_0(%arg0: i32) -> (i32, i32, i32) {
    %c0_i32 = arith.constant 0 : i32
    %c0_i32_0 = arith.constant 0 : i32
    %c0_i32_1 = arith.constant 0 : i32
    return %arg0, %c0_i32, %c0_i32_0 : i32, i32, i32
  }
  func.func @transform_1(%arg0: i32) -> (i32, i32, i32) {
    %c0_i32 = arith.constant 0 : i32
    %c0_i32_0 = arith.constant 0 : i32
    %c0_i32_1 = arith.constant 0 : i32
    return %arg0, %c0_i32, %c0_i32_0 : i32, i32, i32
  }
  func.func @transform_2(%arg0: i32) -> (i32, i32, i32) {
    %c0_i32 = arith.constant 0 : i32
    %c0_i32_0 = arith.constant 0 : i32
    %c0_i32_1 = arith.constant 0 : i32
    return %arg0, %c0_i32, %c0_i32_0 : i32, i32, i32
  }
  func.func @transform_3(%arg0: i32) -> (i32, i32) {
    %c0_i32 = arith.constant 0 : i32
    %c0_i32_0 = arith.constant 0 : i32
    %c0_i32_1 = arith.constant 0 : i32
    return %c0_i32, %c0_i32_0 : i32, i32
  }
  func.func @transform_4(%arg0: i32) -> (i32, i32) {
    %c0_i32 = arith.constant 0 : i32
    %c0_i32_0 = arith.constant 0 : i32
    %c0_i32_1 = arith.constant 0 : i32
    return %c0_i32, %c0_i32_0 : i32, i32
  }
  func.func @transform_5(%arg0: i32) -> (i32, i32) {
    %c0_i32 = arith.constant 0 : i32
    %c0_i32_0 = arith.constant 0 : i32
    %c0_i32_1 = arith.constant 0 : i32
    return %c0_i32, %c0_i32_0 : i32, i32
  }
  func.func @transform_6(%arg0: i32) -> (i32, i32) {
    %c0_i32 = arith.constant 0 : i32
    %c0_i32_0 = arith.constant 0 : i32
    %c0_i32_1 = arith.constant 0 : i32
    return %c0_i32, %c0_i32_0 : i32, i32
  }
  func.func @transform_7(%arg0: i32) -> (i32, i32) {
    %c0_i32 = arith.constant 0 : i32
    %c0_i32_0 = arith.constant 0 : i32
    %c0_i32_1 = arith.constant 0 : i32
    return %c0_i32, %c0_i32_0 : i32, i32
  }
  func.func @transform_8(%arg0: i32) -> (i32, i32) {
    %c0_i32 = arith.constant 0 : i32
    %c0_i32_0 = arith.constant 0 : i32
    %c0_i32_1 = arith.constant 0 : i32
    return %c0_i32, %c0_i32_0 : i32, i32
  }
  func.func @transform_9(%arg0: i32) -> (i32, i32) {
    %c0_i32 = arith.constant 0 : i32
    %c0_i32_0 = arith.constant 0 : i32
    %c0_i32_1 = arith.constant 0 : i32
    return %c0_i32, %c0_i32_0 : i32, i32
  }
  func.func @transform_10(%arg0: i32) -> (i32, i32) {
    %c0_i32 = arith.constant 0 : i32
    %c0_i32_0 = arith.constant 0 : i32
    %c0_i32_1 = arith.constant 0 : i32
    return %c0_i32, %c0_i32_0 : i32, i32
  }
  func.func @transform_11(%arg0: i32) -> (i32, i32, i32) {
    %c0_i32 = arith.constant 0 : i32
    %c0_i32_0 = arith.constant 0 : i32
    %c0_i32_1 = arith.constant 0 : i32
    return %arg0, %c0_i32, %c0_i32_0 : i32, i32, i32
  }
}

</mosaic_0001>

<bundles_post_ra>
// kernel: tpu_custom_call.1
= control target key start
LH: loop header
LB: loop body
LE: loop exit
PB: predicated region body
PF: predicated region fallthrough
CT: control target
= control target key end

     0   :  { %s2449_s0 = inlined_call_operand.hbm [shape: f32[2,8,32], index: 0, kind: input, shape index: {}]   ;;  %s2450_s1 = inlined_call_operand.hbm [shape: f32[2,8,32], index: 1, kind: input, shape index: {}]   ;;  %s2451_s2 = inlined_call_operand.hbm [shape: f32[2,8,32], index: 2, kind: input, shape index: {}]   ;;  %s2452_s3 = inlined_call_operand.hbm [shape: bf16[32,32], index: 3, kind: input, shape index: {}]   ;;  %s2453_s4 = inlined_call_operand.hbm [shape: bf16[32,32], index: 4, kind: input, shape index: {}]   ;;  %s2454_s5 = inlined_call_operand.vmem [shape: bf16[32,32], index: 5, kind: input, shape index: {}]   ;;  %s2455_s6 = inlined_call_operand.vmem [shape: f32[1,32], index: 6, kind: input, shape index: {}]   ;;  %s2456_s7 = inlined_call_operand.vmem [shape: f32[1,32], index: 7, kind: input, shape index: {}]   ;;  %s2457_s8 = inlined_call_operand.hbm [shape: f32[1,32], index: 8, kind: input, shape index: {}]   ;;  %s2458_s9 = inlined_call_operand.vmem [shape: bf16[32,32], index: 9, kind: input, shape index: {}]   ;;  %s2459_s10 = inlined_call_operand.vmem [shape: f32[1,32], index: 10, kind: input, shape index: {}]   ;;  %s2460_s11 = inlined_call_operand.hbm [shape: f32[2,8,32], index: 11, kind: output, shape index: {}]  }
   0x1   :  { %2486 = sst [smem:[#allocation26_spill]] %s2450_s1 }
   0x2   :  { %2487 = sst [smem:[#allocation27_spill]] %s2452_s3 }
   0x3   :  { %2488 = sst [smem:[#allocation28_spill]] %s2454_s5 }
   0x4   :  { %2489 = sst [smem:[#allocation29_spill]] %s2458_s9 }
   0x5   :  { %2490 = sst [smem:[#allocation30_spill]] %s2459_s10 }
   0x6   :  { %2491 = sst [smem:[#allocation31_spill]] %s2460_s11 }
   0x7   :  { %16 = vsyncpa [#allocation4], 0 }
   0x8   :  { %18 = vsyncpa [#allocation4 + $0x1], 0 }
   0x9   :  { %19 = vsyncpa [#allocation7], 0 }
   0xa   :  { %21 = vsyncpa [#allocation7 + $0x1], 0 }
   0xb   :  { %22 = vsyncpa [#allocation10], 0 }
   0xc   :  { %23 = vsyncpa [#allocation13], 0 }
   0xd   :  { %24 = vsyncpa [#allocation5], 0 }
   0xe   :  { %26 = vsyncpa [#allocation5 + $0x1], 0  ;;  %s2015_s17 = smov 0   ;;  %s2017_s18 = smov 0  }
   0xf   :  { %s2019_s19 = smov 0   ;;  %s2021_s20 = smov 0  }
  0x10 LB: > { %2492 = sst [smem:[#allocation20_spill]] %s1924_s17  ;;  %s2036_s21 = sadd.s32 4294967295, %s1936_s20   ;;  %s1936_s20 = sphi %s2021_s20, %s2534_s20   ;;  %s1932_s19 = sphi %s2019_s19, %s2538_s19   ;;  %s1928_s18 = sphi %s2017_s18, %s2537_s18   ;;  %s1924_s17 = sphi %s2015_s17, %s2536_s17  }
  0x11   : > { %2493 = sst [smem:[#allocation21_spill]] %s1936_s20  ;;  %s1407_s22 = sadd.s32 4294967294, %s1936_s20  }
  0x12   : > { %p52_p0 = scmp.ne.s32.totalorder %s1928_s18, %s1924_s17  ;;  %p2463_p1 = scmp.eq.s32.totalorder %s2036_s21, 0 }
  0x13   : > { %p302_p3 = scmp.eq.s32.totalorder %s1407_s22, 1  ;;  %p1408_p5 = scmp.ge.s32.totalorder %s1936_s20, 1 }
  0x14   : > { %p2045_p4 = por %p2463_p1, %p52_p0  ;;  %p309_p7 = scmp.lt.s32.totalorder %s1936_s20, 3 }
  0x15   : > { %p2050_p6 = por %p302_p3, %p52_p0  ;;  %s1938_s26 = smov [#allocation9]  }
  0x16   : > { %s2494_s23 = scalar_select %p2045_p4, 1, 0 }
  0x17   : > { %s2495_s24 = scalar_select %p2050_p6, 1, 0 }
  0x18   : > { %p2055_p8 = pnand %p1408_p5, %p309_p7  ;;  %s321_s27 = sshll.u32 %s1938_s26, 4  ;;  %s2059_s27 = int_to_ptr.vmem [resolvable:$true] %s321_s27 }
  0x19   : > { %2496 = sst [smem:[#allocation22_spill]] %s2495_s24  ;;  %s2071_s29 = sadd.s32 1, %s1936_s20  }
  0x1a   : > { %s2497_s25 = scalar_select %p2055_p8, 1, 0 }
  0x1b   : > { %p1583_p9 = pneg %p2055_p8  ;;  %2499 = sst [smem:[#allocation23_spill]] %s2071_s29 }
  0x1c   : > { %s39_s30 = sadd.s32 1, %s1932_s19  ;;  %s36_s12 = ssub.s32 %s1936_s20, %s2071_s29 }
  0x1d   : > { %p2066_p11 = pnand %p1583_p9, %p2463_p1  ;;  %s2500_s3 = sld [smem:[#allocation27_spill]] }
  0x1f   : > { %s2498_s28 = scalar_select %p2066_p11, 1, 0 }
  0x20   : > { %p2084_p13 = pneg %p2066_p11 }
  0x22   : > { %s2501_s26 = scalar_select %p2084_p13, 1, 0 }
  0x23   : > { %s1684_s15 = scalar_lea.hbm %s2500_s3, 256 }
  0x24   : > { %p1685_p12 = scmp.ne.s32.totalorder %s2500_s3, %s1684_s15  ;;  %p1691_p5 = scmp.lt.u32.totalorder %s1684_s15, %s2500_s3 }
  0x26   : > { %p1687_p0 = pnand %p2084_p13, %p1685_p12 }
  0x28   : > { %p1688_p3 = pneg %p1687_p0 }
  0x2a   : > { %p1693_p7 = pnand %p1691_p5, %p1688_p3 }
  0x2c   : > { %1696 = shalt.err (!%p1693_p7)
}
  0x2d   : > { %s1697_s13 = scalar_lea.vmem %s2059_s27, 256  ;;  %p1705_p2 = scmp.lt.s32.totalorder %s2059_s27, %s2059_s27 }
  0x2e   : > { %p1698_p9 = scmp.ne.s32.totalorder %s2059_s27, %s1697_s13  ;;  %p1706_p6 = scmp.lt.s32.totalorder %s1697_s13, %s1697_s13 }
  0x30   : > { %p1700_p10 = pnand %p1698_p9, %p2084_p13  ;;  %p1707_p12 = por %p1706_p6, %p1705_p2 }
  0x32   : > { %p1701_p1 = pneg %p1700_p10 }
  0x34   : > { %p1708_p0 = pnand %p1707_p12, %p1701_p1 }
  0x36   : > { %1711 = shalt.err (!%p1708_p0)
}
  0x37   : > { %s2467_s14 = smov 64   ;;  %s2468_s17 = smov 4  }
  0x38   : > { %1586 = dma.hbm_to_vmem [thread:$0]  (!%p2066_p11), %s2500_s3, 256, %s2059_s27, [#allocation10], %s2467_s14, %s2467_s14, %s2468_s17  }
  0x39   : > { %p37_p1 = scmp.eq.s32.totalorder %s36_s12, 0  ;;  %p46_p2 = scmp.ne.s32.totalorder %s1932_s19, %s1928_s18 }
  0x3a   : > { %p47_p6 = scmp.eq.s32.totalorder %s1936_s20, 0  ;;  %p1610_p10 = scmp.lt.s32.totalorder %s1936_s20, 2 }
  0x3b   : > { %s2113_s16 = scalar_select %p37_p1, %s1932_s19, %s39_s30  }
  0x3c   : > { %p48_p3 = por %p47_p6, %p46_p2  ;;  %p2503_p5 = scmp.eq.s32.totalorder %s2036_s21, 1 }
  0x3d   : > { %2502 = sst [smem:[#allocation24_spill]] %s2113_s16  ;;  %s2469_s13 = sand.u32 1, %s1932_s19  }
  0x3e   : > { %p2117_p7 = por %p2503_p5, %p46_p2  ;;  %s2123_s29 = sshll.u32 %s1936_s20, 7 }
  0x3f   : > { %s2127_s11 = sshll.u32 %s2469_s13, 3  ;;  %p2129_p9 = pnand %p1610_p10, %p48_p3 }
  0x40   : > { %s2504_s22 = scalar_select %p2117_p7, 1, 0 }
  0x41   : > { %s2506_s27 = scalar_select %p2129_p9, 1, 0 }
  0x42   : > { %2505 = sst [smem:[#allocation25_spill]] %s2504_s22  ;;  %s392_s30 = sand.u32 1, %s1936_s20  }
  0x43   : > { %s2507_s1 = sld [smem:[#allocation26_spill]]  ;;  %s396_s14 = scalar_lea.vmem [#allocation6], %s2127_s11 }
  0x44   : > { %s403_s17 = sshll.u32 %s396_s14, 4  ;;  %s2143_s13 = scalar_lea.sflag [#allocation7], %s392_s30  ;;  %s2141_s17 = int_to_ptr.vmem [resolvable:$true] %s403_s17 }
  0x45   : > { %p2149_p0 = pneg %p2129_p9 }
  0x47   : > { %s2508_s16 = scalar_select %p2149_p0, 1, 0 }
  0x49   : > { %s2138_s15 = scalar_lea.hbm %s2507_s1, %s2123_s29  ;;  %s1717_s20 = scalar_lea.hbm %s2507_s1, 256 }
  0x4a   : > { %s1712_s3 = scalar_lea.hbm %s2138_s15, 128  ;;  %p1718_p6 = scmp.lt.u32.totalorder %s2138_s15, %s2507_s1 }
  0x4b   : > { %p1713_p12 = scmp.ne.s32.totalorder %s2138_s15, %s1712_s3  ;;  %p1719_p10 = scmp.lt.u32.totalorder %s1717_s20, %s1712_s3 }
  0x4c   : > { %p1721_p5 = scmp.lt.u32.totalorder %s1712_s3, %s2138_s15 }
  0x4d   : > { %p1715_p1 = pnand %p2149_p0, %p1713_p12  ;;  %p1720_p3 = por %p1719_p10, %p1718_p6 }
  0x4f   : > { %p1716_p2 = pneg %p1715_p1  ;;  %p1722_p7 = por %p1721_p5, %p1720_p3 }
  0x51   : > { %p1723_p4 = pnand %p1722_p7, %p1716_p2 }
  0x53   : > { %1726 = shalt.err (!%p1723_p4)
}
  0x54   : > { %s1727_s30 = scalar_lea.vmem %s2141_s17, 128  ;;  %s1941_s12 = smov [#allocation6]  }
  0x55   : > { %p1728_p12 = scmp.ne.s32.totalorder %s2141_s17, %s1727_s30  ;;  %s1732_s24 = sshll.u32 %s1941_s12, 4  ;;  %s1733_s24 = int_to_ptr.vmem [resolvable:$false] %s1732_s24 }
  0x56   : > { %s1734_s22 = scalar_lea.vmem %s1733_s24, 256  ;;  %p1735_p11 = scmp.lt.s32.totalorder %s2141_s17, %s1733_s24 }
  0x57   : > { %p1730_p1 = pnand %p1728_p12, %p2149_p0  ;;  %p1736_p13 = scmp.lt.s32.totalorder %s1734_s22, %s1727_s30 }
  0x59   : > { %p1731_p8 = pneg %p1730_p1  ;;  %p1737_p6 = por %p1736_p13, %p1735_p11 }
  0x5b   : > { %p1738_p10 = pnand %p1737_p6, %p1731_p8 }
  0x5d   : > { %1741 = shalt.err (!%p1738_p10)
}
  0x5e   : > { %1599 = dma.hbm_to_vmem [thread:$0]  (!%p2129_p9), %s2138_s15, 128, %s2141_s17, %s2143_s13  }
  0x5f   : > { %s1942_s3 = smov [#allocation11]   ;;  %s1943_s14 = smov [#allocation12]  }
  0x60   : > { %s334_s20 = sshll.u32 %s1942_s3, 4  ;;  %s357_s1 = sshll.u32 %s1943_s14, 4  ;;  %s335_s20 = int_to_ptr.vmem [resolvable:$true] %s334_s20  ;;  %s358_s1 = int_to_ptr.vmem [resolvable:$true] %s357_s1 }
  0x61   : > { %s1742_s24 = scalar_lea.hbm %s2453_s4, 256  ;;  %p2509_p8 = scmp.ne.s32.totalorder %s2501_s26, 0 }
  0x62   : > { %p1743_p4 = scmp.ne.s32.totalorder %s2453_s4, %s1742_s24  ;;  %p1749_p7 = scmp.lt.u32.totalorder %s1742_s24, %s2453_s4 }
  0x64   : > { %p1745_p11 = pnand %p1743_p4, %p2509_p8 }
  0x66   : > { %p1746_p13 = pneg %p1745_p11 }
  0x68   : > { %p1751_p2 = pnand %p1749_p7, %p1746_p13 }
  0x6a   : > { %1754 = shalt.err (!%p1751_p2)
}
  0x6b   : > { %s1755_s17 = scalar_lea.vmem %s335_s20, 256  ;;  %p1763_p1 = scmp.lt.s32.totalorder %s335_s20, %s335_s20 }
  0x6c   : > { %p1756_p3 = scmp.ne.s32.totalorder %s335_s20, %s1755_s17  ;;  %p1764_p6 = scmp.lt.s32.totalorder %s1755_s17, %s1755_s17 }
  0x6e   : > { %p1758_p5 = pnand %p1756_p3, %p2509_p8  ;;  %p1765_p10 = por %p1764_p6, %p1763_p1 }
  0x70   : > { %p1759_p12 = pneg %p1758_p5 }
  0x72   : > { %p1766_p9 = pnand %p1765_p10, %p1759_p12 }
  0x74   : > { %1769 = shalt.err (!%p1766_p9)
}
  0x75   : > { %p2510_p4 = scmp.ne.s32.totalorder %s2498_s28, 0  ;;  %s2511_s10 = smov 4  }
  0x76   : > { %s2512_s15 = smov 64   ;;  %s1770_s12 = scalar_lea.hbm %s2457_s8, 16 }
  0x77   : > { %1589 = dma.hbm_to_vmem [thread:$0]  (!%p2510_p4), %s2453_s4, 256, %s335_s20, [#allocation10], %s2512_s15, %s2512_s15, %s2511_s10  }
  0x78   : > { %p1771_p11 = scmp.ne.s32.totalorder %s2457_s8, %s1770_s12  ;;  %p1777_p7 = scmp.lt.u32.totalorder %s1770_s12, %s2457_s8 }
  0x7a   : > { %p1773_p9 = pnand %p1771_p11, %p2509_p8 }
  0x7c   : > { %p1774_p13 = pneg %p1773_p9 }
  0x7e   : > { %p1779_p2 = pnand %p1777_p7, %p1774_p13 }
  0x80   : > { %1782 = shalt.err (!%p1779_p2)
}
  0x81   : > { %s1783_s5 = scalar_lea.vmem %s358_s1, 16  ;;  %s1790_s20 = scalar_lea.vmem %s358_s1, 32 }
  0x82   : > { %p1784_p3 = scmp.ne.s32.totalorder %s358_s1, %s1783_s5  ;;  %p1791_p1 = scmp.lt.s32.totalorder %s358_s1, %s358_s1 }
  0x83   : > { %p1792_p6 = scmp.lt.s32.totalorder %s1790_s20, %s1783_s5 }
  0x84   : > { %p1786_p5 = pnand %p1784_p3, %p2509_p8 }
  0x85   : > { %p1793_p10 = por %p1792_p6, %p1791_p1 }
  0x86   : > { %p1787_p12 = pneg %p1786_p5 }
  0x88   : > { %p1794_p0 = pnand %p1793_p10, %p1787_p12 }
  0x8a   : > { %1797 = shalt.err (!%p1794_p0)
}
  0x8b   : > { %1592 = dma.hbm_to_vmem [thread:$0]  (!%p2510_p4), %s2457_s8, 16, %s358_s1, [#allocation13]  }
  0x8c   : > { %s2216_s3 = scalar_lea.hbm %s2449_s0, %s2123_s29  ;;  %s378_s14 = scalar_lea.vmem [#allocation3], %s2127_s11 }
  0x8d   : > { %s385_s28 = sshll.u32 %s378_s14, 4  ;;  %s2225_s30 = scalar_lea.hbm %s2451_s2, %s2123_s29  ;;  %s2219_s28 = int_to_ptr.vmem [resolvable:$true] %s385_s28 }
  0x8e   : > { %s2513_s22 = sand.u32 1, %s1932_s19   ;;  %s1798_s17 = scalar_lea.hbm %s2216_s3, 128 }
  0x8f   : > { %s375_s1 = scalar_lea.sflag [#allocation4], %s2513_s22  ;;  %p1799_p0 = scmp.ne.s32.totalorder %s2216_s3, %s1798_s17 }
  0x90   : > { %p2514_p8 = scmp.ne.s32.totalorder %s2508_s16, 0  ;;  %s1803_s10 = scalar_lea.hbm %s2449_s0, 256 }
  0x91   : > { %p1804_p9 = scmp.lt.u32.totalorder %s2216_s3, %s2449_s0  ;;  %p1805_p13 = scmp.lt.u32.totalorder %s1803_s10, %s1798_s17 }
  0x92   : > { %p1801_p4 = pnand %p1799_p0, %p2514_p8  ;;  %p1807_p2 = scmp.lt.u32.totalorder %s1798_s17, %s2216_s3 }
  0x93   : > { %p1806_p7 = por %p1805_p13, %p1804_p9 }
  0x94   : > { %p1802_p11 = pneg %p1801_p4 }
  0x95   : > { %p1808_p3 = por %p1807_p2, %p1806_p7 }
  0x97   : > { %p1809_p5 = pnand %p1808_p3, %p1802_p11 }
  0x99   : > { %1812 = shalt.err (!%p1809_p5)
}
  0x9a   : > { %s1813_s29 = scalar_lea.vmem %s2219_s28, 128  ;;  %s1944_s9 = smov [#allocation3]  }
  0x9b   : > { %p1814_p12 = scmp.ne.s32.totalorder %s2219_s28, %s1813_s29  ;;  %s1818_s14 = sshll.u32 %s1944_s9, 4  ;;  %s1819_s14 = int_to_ptr.vmem [resolvable:$false] %s1818_s14 }
  0x9c   : > { %s1820_s12 = scalar_lea.vmem %s1819_s14, 256  ;;  %p1821_p10 = scmp.lt.s32.totalorder %s2219_s28, %s1819_s14 }
  0x9d   : > { %p1816_p1 = pnand %p1814_p12, %p2514_p8  ;;  %p1822_p0 = scmp.lt.s32.totalorder %s1820_s12, %s1813_s29 }
  0x9f   : > { %p1817_p6 = pneg %p1816_p1  ;;  %p1823_p4 = por %p1822_p0, %p1821_p10 }
  0xa1   : > { %p1824_p9 = pnand %p1823_p4, %p1817_p6 }
  0xa3   : > { %1827 = shalt.err (!%p1824_p9)
}
  0xa4   : > { %p2515_p11 = scmp.ne.s32.totalorder %s2506_s27, 0  ;;  %s414_s24 = scalar_lea.vmem [#allocation8], %s2127_s11 }
  0xa5   : > { %s421_s22 = sshll.u32 %s414_s24, 4  ;;  %s1828_s17 = scalar_lea.hbm %s2225_s30, 128  ;;  %s422_s22 = int_to_ptr.vmem [resolvable:$true] %s421_s22 }
  0xa6   : > { %1596 = dma.hbm_to_vmem [thread:$0]  (!%p2515_p11), %s2216_s3, 128, %s2219_s28, %s375_s1  }
  0xa7   : > { %p1829_p13 = scmp.ne.s32.totalorder %s2225_s30, %s1828_s17  ;;  %s1833_s10 = scalar_lea.hbm %s2451_s2, 256 }
  0xa8   : > { %p1834_p3 = scmp.lt.u32.totalorder %s2225_s30, %s2451_s2  ;;  %p1835_p5 = scmp.lt.u32.totalorder %s1833_s10, %s1828_s17 }
  0xa9   : > { %p1831_p7 = pnand %p1829_p13, %p2514_p8  ;;  %p1837_p1 = scmp.lt.u32.totalorder %s1828_s17, %s2225_s30 }
  0xaa   : > { %p1836_p12 = por %p1835_p5, %p1834_p3 }
  0xab   : > { %p1832_p2 = pneg %p1831_p7 }
  0xac   : > { %p1838_p6 = por %p1837_p1, %p1836_p12 }
  0xae   : > { %p1839_p10 = pnand %p1838_p6, %p1832_p2 }
  0xb0   : > { %1842 = shalt.err (!%p1839_p10)
}
  0xb1   : > { %s1843_s11 = scalar_lea.vmem %s422_s22, 128  ;;  %s1945_s3 = smov [#allocation8]  }
  0xb2   : > { %p1844_p0 = scmp.ne.s32.totalorder %s422_s22, %s1843_s11  ;;  %s1848_s28 = sshll.u32 %s1945_s3, 4  ;;  %s1849_s28 = int_to_ptr.vmem [resolvable:$false] %s1848_s28 }
  0xb3   : > { %s1850_s1 = scalar_lea.vmem %s1849_s28, 256  ;;  %p1851_p13 = scmp.lt.s32.totalorder %s422_s22, %s1849_s28 }
  0xb4   : > { %p1846_p4 = pnand %p1844_p0, %p2514_p8  ;;  %p1852_p7 = scmp.lt.s32.totalorder %s1850_s1, %s1843_s11 }
  0xb6   : > { %p1847_p9 = pneg %p1846_p4  ;;  %p1853_p11 = por %p1852_p7, %p1851_p13 }
  0xb8   : > { %p1854_p3 = pnand %p1853_p11, %p1847_p9 }
  0xba   : > { %1857 = shalt.err (!%p1854_p3)
}
  0xbb   : > { %p2516_p5 = scmp.ne.s32.totalorder %s2506_s27, 0  ;;  %p2517_p2 = scmp.ne.s32.totalorder %s2497_s25, 0 }
  0xbc   : > { %s2272_s16 = sand.u32 (!%p2517_p2), 1, %s1928_s18   ;;  %p2518_p8 = scmp.ne.s32.totalorder (!%p2517_p2), %s2494_s23, 0 }
  0xbd   : > { %1602 = dma.hbm_to_vmem [thread:$0]  (!%p2516_p5), %s2225_s30, 128, %s422_s22, %s2143_s13  }
  0xbe   : > { %430 = sbr.rel (%p2517_p2) target bundleno = 1666 (0x682), region = 64  ;;  %s2275_s29 = sshll.u32 (!%p2517_p2), %s2272_s16, 3 }
  0xbf   : > { %s433_s9 = scalar_lea.sflag (!%p2517_p2), [#allocation4], %s2272_s16  ;;  %s436_s14 = scalar_lea.vmem (!%p2517_p2), [#allocation3], %s2275_s29 }
  0xc5   : > { %1903 = dma.done.wait (%p2518_p8), %s433_s9, 128  }
  0xc6   : > { %1905 = vsyncadd (%p2518_p8), %s433_s9, 4294967168  ;;  %s441_s25 = sand.u32 1, %s2036_s21   ;;  %s445_s27 = scalar_lea.vmem [#allocation6], %s2275_s29 }
  0xc7   : > { %s442_s13 = scalar_lea.sflag [#allocation7], %s441_s25 }
  0xc8   : > { %1907 = dma.done.wait (%p2518_p8), %s442_s13, 256  }
  0xc9   : > { %1909 = vsyncadd (%p2518_p8), %s442_s13, 4294967040  ;;  %s454_s30 = scalar_lea.vmem [#allocation8], %s2275_s29  ;;  %p2519_p11 = scmp.eq.s32.totalorder %s2036_s21, 0 }
  0xcb   : > { %1911 = dma.done.wait (%p2519_p11), [#allocation10], 512   ;;  %p2520_p12 = pmov %p2519_p11 }
  0xcc   : > { %p2521_p1 = pmov %p2519_p11 }
  0xcd   : > { %1913 = vsyncadd (%p2520_p12), [#allocation10], 4294966784 }
  0xce   : > { %1915 = dma.done.wait (%p2521_p1), [#allocation13], 16   ;;  %p2522_p6 = pmov %p2521_p1 }
  0xcf   : > { %v1946_v0 = vmov 0.0   ;;  %vm1947_vm0 = vmmov 0   ;;  %v1660_v1 = vld [vmem:[#allocation11] sm:$0xff]   ;;  %v1661_v2 = vld [vmem:[#allocation9] sm:$0xff]   ;;  %v1662_v3 = vld [vmem:[#allocation11 + $0x8] sm:$0xff]   ;;  %vm545_vm1 = vcmask 261120  }
  0xd0   : > { %1917 = vsyncadd (%p2522_p6), [#allocation13], 4294967280  ;;  %1491 = vmatprep.subr.bf16.mxu1 %v1946_v0  ;;  %1483 = vmatprep.subr.bf16.mxu0 %v1946_v0  ;;  %v518_v4 = vld [vmem:[%s445_s27] sm:$0xff]  ;;  %v516_v6 = vld [vmem:[%s436_s14] sm:$0xff]  ;;  %vm724_vm2 = vcmask 64512   ;;  %s1948_s17 = smov 112  }
  0xd1   : > { %1495 = vmatprep.mubr.msk.bf16.mxu1 %vm1947_vm0, %v1946_v0  ;;  %1487 = vmatprep.mubr.msk.bf16.mxu0 %vm1947_vm0, %v1946_v0  ;;  %v1663_v5 = vld [vmem:[#allocation9 + $0x8] sm:$0xff]   ;;  %v519_v7 = vpack.c.bf16 %v518_v4, %v518_v4  ;;  %v517_v8 = vpack.c.bf16 %v516_v6, %v516_v6  ;;  %s1949_s5 = smov 120   ;;  %s1950_s20 = smov 104   ;;  %v520_v26 = vld [vmem:[%s454_s30] sm:$0xff]  ;;  %v1435_v42 = vld [vmem:[#allocation12] ss:$0 sm:$0xff] }
  0xd2   : > { %1492 = vmatpush3.bf16.msra.mxu1 %v1660_v1  ;;  %1484 = vmatpush3.bf16.msra.mxu0 %v1661_v2  ;;  %v1431_v9 = vld [vmem:[%s2456_s7] ss:$0 sm:$0xff]  ;;  %s2523_s26 = sld [smem:[#allocation28_spill]]  ;;  %v521_v27 = vpack.c.bf16 %v520_v26, %v520_v26  ;;  %vm786_vm3 = vcmask 1043456   ;;  %s1951_s28 = smov 8   ;;  %vm948_vm4 = vcmask 130112  }
  0xd3   : > { %1493 = vmatprep.subr.bf16.mxu1 %v1946_v0  ;;  %1485 = vmatprep.subr.bf16.mxu0 %v1946_v0  ;;  %v1427_v10 = vld [vmem:[%s2455_s6] ss:$0 sm:$0xff]  ;;  %s2524_s14 = sld [smem:[#allocation29_spill]]  ;;  %s1952_s27 = smov 16   ;;  %vm1064_vm5 = vcmask 195712   ;;  %vm1180_vm6 = vcmask 261312  }
  0xd4   : > { %s1953_s30 = smov 24   ;;  %s2525_s24 = sld [smem:[#allocation30_spill]] }
  0xd5   : > { %s2526_s22 = sld [smem:[#allocation25_spill]]  ;;  %s2527_s11 = sld [smem:[#allocation31_spill]] }
  0xd6   : > { %1494 = vmatpush3.bf16.msra.mxu1 %v1662_v3  ;;  %1486 = vmatpush3.bf16.msra.mxu0 %v1663_v5 }
  0xd7   : > { %1507 = vmatprep.subr.bf16.mxu1 %v1946_v0  ;;  %1499 = vmatprep.subr.bf16.mxu0 %v1946_v0 }
  0xd8   : > { %v1664_v24 = vld [vmem:[%s2523_s26] sm:$0xff]   ;;  %v1665_v25 = vld [vmem:[%s2523_s26 + $0x8] sm:$0xff]  }
  0xd9   : > { %1496 = vmatmul.mubr.msk.bf16.vlgmr.msra.gmra.mrb[0].mxu1 %vm545_vm1, %v519_v7  ;;  %1488 = vmatmul.mubr.msk.bf16.vlgmr.msra.gmra.mrb[0].mxu0 %vm545_vm1, %v517_v8 }
  0xda   : > { %1509 = vmatprep.mubr.msk.bf16.mxu1 %vm1947_vm0, %v1946_v0  ;;  %1503 = vmatprep.mubr.msk.bf16.mxu0 %vm1947_vm0, %v1946_v0 }
  0xdb   : > { %1500 = vmatpush3.bf16.msra.mxu0 %v1664_v24  ;;  %p2528_p0 = scmp.ne.s32.totalorder %s2526_s22, 0 }
  0xdc   : > { %1501 = vmatprep.subr.bf16.mxu0 %v1946_v0 }
  0xdf   : > { %1502 = vmatpush3.bf16.msra.mxu0 %v1665_v25 }
  0xe0   : > { %1513 = vmatprep.subr.bf16.mxu0 %v1946_v0 }
  0xe2   : > { %1504 = vmatmul.mubr.msk.bf16.vlgmr.msra.gmra.mrb[4].mxu0 %vm545_vm1, %v521_v27 }
  0xe3   : > { %1515 = vmatprep.mubr.msk.bf16.mxu0 %vm1947_vm0, %v1946_v0 }
 0x1ac   : > { %v649_v11 = vpop.f32.mrb[0].mxu1  ;;  %v583_v14 = vpop.f32.mrb[0].mxu0 }
 0x1ad   : > { %v650_v12 = vadd.f32 %v1431_v9, %v649_v11  ;;  %v1497_v13 = vpop.f32.mrb[1].mxu1  ;;  %v584_v16 = vadd.f32 %v1427_v10, %v583_v14  ;;  %v1489_v17 = vpop.f32.mrb[1].mxu0 }
 0x1ae   : > { %v652_v15 = vpop.f32.mrb[2].mxu1  ;;  %v586_v20 = vpop.f32.mrb[2].mxu0 }
 0x1af   : > { %v722_v18 = vpack.c.bf16 %v650_v12, %v650_v12  ;;  %v1498_v19 = vpop.f32.mrb[3].mxu1  ;;  %v1490_v21 = vpop.f32.mrb[3].mxu0  ;;  %v721_v22 = vpack.c.bf16 %v584_v16, %v584_v16 }
 0x1b1   : > { %952 = vrot.lane.b32.xlu1 %v722_v18, %s1948_s17  ;;  %835 = vrot.lane.b32.xlu0 %v722_v18, %s1949_s5  ;;  %v729_v23 = vsel %vm724_vm2, %v722_v18, 0 }
 0x1b2   : > { %1508 = vmatpush3.bf16.xpose.msra.mxu1 %v729_v23 }
 0x1b3   : > { %1519 = vmatprep.subr.bf16.mxu1 %v1946_v0 }
 0x1b5   : > { %950 = vrot.lane.b32.xlu1 %v721_v22, %s1948_s17  ;;  %832 = vrot.lane.b32.xlu0 %v721_v22, %s1949_s5  ;;  %v715_v43 = vpop.f32.mrb[4].mxu0 }
 0x1b6   : > { %v716_v44 = vadd.f32 %v1435_v42, %v715_v43  ;;  %v1505_v45 = vpop.f32.mrb[5].mxu0 }
 0x1b7   : > { %v718_v46 = vpop.f32.mrb[6].mxu0 }
 0x1b8   : > { %v723_v47 = vpack.c.bf16 %v716_v44, %v716_v44  ;;  %v1506_v48 = vpop.f32.mrb[7].mxu0 }
 0x1b9   : > { %1066 = vrot.lane.b32.xlu1 %v721_v22, %s1950_s20  ;;  %1068 = vrot.lane.b32.xlu0 %v722_v18, %s1950_s20 }
 0x1ba   : > { %1510 = vmatmul.mubr.msk.bf16.vlgmr.msra.gmra.mrb[4].mxu1 %vm724_vm2, %v721_v22  ;;  %v788_v49 = vsel %vm786_vm3, %v723_v47, 0 }
 0x1bb   : > { %1521 = vmatprep.mubr.msk.bf16.mxu1 %vm1947_vm0, %v1946_v0  ;;  %1514 = vmatpush3.bf16.msra.mxu0 %v788_v49 }
 0x1bc   : > { %1525 = vmatprep.subr.bf16.mxu0 %v1946_v0 }
 0x223   : > { %v836_v28 = vpop.permute.xlu0 %835  ;;  %v953_v30 = vpop.permute.xlu1 %952 }
 0x224   : > { %v841_v29 = vsel %vm724_vm2, %v836_v28, 0  ;;  %v958_v32 = vsel %vm724_vm2, %v953_v30, 0 }
 0x225   : > { %1520 = vmatpush3.bf16.xpose.msra.mxu1 %v841_v29 }
 0x226   : > { %1531 = vmatprep.subr.bf16.mxu1 %v1946_v0 }
 0x227   : > { %v833_v31 = vpop.permute.xlu0 %832  ;;  %v951_v34 = vpop.permute.xlu1 %950 }
 0x22b   : > { %v1069_v33 = vpop.permute.xlu0 %1068  ;;  %v1067_v36 = vpop.permute.xlu1 %1066 }
 0x22c   : > { %1522 = vmatmul.mubr.msk.bf16.vlgmr.msra.gmra.mrb[8].mxu1 %vm724_vm2, %v833_v31  ;;  %v1074_v35 = vsel %vm724_vm2, %v1069_v33, 0 }
 0x22d   : > { %1532 = vmatpush3.bf16.xpose.msra.mxu1 %v958_v32  ;;  %1533 = vmatprep.mubr.msk.bf16.mxu1 %vm1947_vm0, %v1946_v0 }
 0x22e   : > { %1543 = vmatprep.subr.bf16.mxu1 %v1946_v0 }
 0x234   : > { %1534 = vmatmul.mubr.msk.bf16.vlgmr.msra.gmra.mrb[12].mxu1 %vm724_vm2, %v951_v34 }
 0x235   : > { %1544 = vmatpush3.bf16.xpose.msra.mxu1 %v1074_v35  ;;  %1545 = vmatprep.mubr.msk.bf16.mxu1 %vm1947_vm0, %v1946_v0 }
 0x236   : > { %1555 = vmatprep.subr.bf16.mxu1 %v1946_v0 }
 0x23c   : > { %1546 = vmatmul.mubr.msk.bf16.vlgmr.msra.gmra.mrb[16].mxu1 %vm724_vm2, %v1067_v36 }
 0x23d   : > { %1559 = vmatprep.mubr.msk.bf16.mxu1 %vm1947_vm0, %v1946_v0 }
 0x28d   : > { %v765_v37 = vpop.f32.mrb[4].mxu1 }
 0x28e   : > { %v1511_v38 = vpop.f32.mrb[5].mxu1  ;;  %v771_v39 = vsel %vm724_vm2, %v765_v37, -inf }
 0x28f   : > { %772 = vmax.xlane.f32.xlu0 %v771_v39  ;;  %v768_v40 = vpop.f32.mrb[6].mxu1 }
 0x290   : > { %v1512_v41 = vpop.f32.mrb[7].mxu1 }
 0x2ff   : > { %v877_v50 = vpop.f32.mrb[8].mxu1 }
 0x300   : > { %v1523_v51 = vpop.f32.mrb[9].mxu1  ;;  %v883_v52 = vsel %vm724_vm2, %v877_v50, -inf }
 0x301   : > { %884 = vmax.xlane.f32.xlu1 %v883_v52  ;;  %v880_v53 = vpop.f32.mrb[10].mxu1  ;;  %v1666_v52 = vld [vmem:[%s2524_s14] sm:$0xff]  }
 0x302   : > { %v1524_v54 = vpop.f32.mrb[11].mxu1  ;;  %1556 = vmatpush3.bf16.msra.mxu1 %v1666_v52  ;;  %v1667_v53 = vld [vmem:[%s2524_s14 + $0x8] sm:$0xff]  }
 0x303   : > { %1557 = vmatprep.subr.bf16.mxu1 %v1946_v0 }
 0x306   : > { %1558 = vmatpush3.bf16.msra.mxu1 %v1667_v53 }
 0x307   : > { %v994_v55 = vpop.f32.mrb[12].mxu1 }
 0x308   : > { %v1535_v56 = vpop.f32.mrb[13].mxu1  ;;  %v1000_v57 = vsel %vm724_vm2, %v994_v55, -inf }
 0x309   : > { %1001 = vmax.xlane.f32.xlu0 %v1000_v57  ;;  %v997_v58 = vpop.f32.mrb[14].mxu1 }
 0x30a   : > { %v1536_v59 = vpop.f32.mrb[15].mxu1 }
 0x30f   : > { %v1110_v60 = vpop.f32.mrb[16].mxu1 }
 0x310   : > { %v1547_v61 = vpop.f32.mrb[17].mxu1  ;;  %v1116_v62 = vsel %vm724_vm2, %v1110_v60, -inf }
 0x311   : > { %1117 = vmax.xlane.f32.xlu0 %v1116_v62  ;;  %v1113_v63 = vpop.f32.mrb[18].mxu1 }
 0x312   : > { %v1548_v1 = vpop.f32.mrb[19].mxu1 }
 0x31c   : > { %v773_v2 = vpop.xlane.xlu0 %772 }
 0x31d   : > { %v774_v3 = vsub.f32 %v765_v37, %v773_v2 }
 0x31f   : > { %v775_v4 = vmul.f32 1.442695, %v774_v3  ;;  %v1447_v3 = vld [vmem:[%s2525_s24] ss:$0 sm:$0xff] }
 0x321   : > { %1668 = vpow2.f32 %v775_v4 }
 0x32b   : > { %v1669_v5 = vpop.eup %1668 }
 0x32c   : > { %v777_v6 = vsel %vm724_vm2, %v1669_v5, 0.0 }
 0x32d   : > { %778 = vadd.xlane.f32.xlu1 %v777_v6 }
 0x33e   : > { %896 = vrot.lane.b32.xlu1 %v723_v47, %s1949_s5  ;;  %s514_s5 = scalar_lea.vmem [#allocation14], %s2275_s29 }
 0x38e   : > { %v885_v7 = vpop.xlane.xlu1 %884 }
 0x38f   : > { %v886_v8 = vsub.f32 %v877_v50, %v885_v7 }
 0x391   : > { %v887_v9 = vmul.f32 1.442695, %v886_v8 }
 0x393   : > { %1670 = vpow2.f32 %v887_v9 }
 0x396   : > { %v1002_v10 = vpop.xlane.xlu0 %1001 }
 0x397   : > { %v1003_v11 = vsub.f32 %v994_v55, %v1002_v10 }
 0x399   : > { %v1004_v12 = vmul.f32 1.442695, %v1003_v11 }
 0x39b   : > { %1672 = vpow2.f32 %v1004_v12 }
 0x39d   : > { %v1671_v13 = vpop.eup %1670 }
 0x39e   : > { %v1118_v14 = vpop.xlane.xlu0 %1117  ;;  %v889_v15 = vsel %vm724_vm2, %v1671_v13, 0.0 }
 0x39f   : > { %v1119_v16 = vsub.f32 %v1110_v60, %v1118_v14  ;;  %890 = vadd.xlane.f32.xlu0 %v889_v15 }
 0x3a1   : > { %v1120_v17 = vmul.f32 1.442695, %v1119_v16 }
 0x3a3   : > { %1674 = vpow2.f32 %v1120_v17 }
 0x3a5   : > { %v1673_v18 = vpop.eup %1672 }
 0x3a6   : > { %v1006_v19 = vsel %vm724_vm2, %v1673_v18, 0.0 }
 0x3a7   : > { %1007 = vadd.xlane.f32.xlu1 %v1006_v19 }
 0x3ad   : > { %v1675_v20 = vpop.eup %1674 }
 0x3ae   : > { %v1122_v21 = vsel %vm724_vm2, %v1675_v20, 0.0 }
 0x3af   : > { %1123 = vadd.xlane.f32.xlu0 %v1122_v21 }
 0x3b8   : > { %1128 = vrot.lane.b32.xlu1 %v723_v47, %s1950_s20  ;;  %s1265_s20 = sshll.u32 %s514_s5, 4  ;;  %s2406_s20 = int_to_ptr.vmem [resolvable:$true] %s1265_s20 }
 0x3b9   : > { %s1858_s29 = scalar_lea.vmem %s2406_s20, 128 }
 0x3ba   : > { %v779_v22 = vpop.xlane.xlu1 %778  ;;  %p1859_p10 = scmp.ne.s32.totalorder %s2406_s20, %s1858_s29 }
 0x3bb   : > { %1676 = vrcp.f32 %v779_v22 }
 0x3bc   : > { %p1860_p4 = pnand %p1859_p10, %p2528_p0 }
 0x3be   : > { %v897_v24 = vpop.permute.xlu1 %896  ;;  %p1861_p9 = pneg %p1860_p4 }
 0x3bf   : > { %v902_v27 = vsel %vm786_vm3, %v897_v24, 0 }
 0x3c5   : > { %v1677_v23 = vpop.eup %1676  ;;  %1012 = vrot.lane.b32.xlu0 %v723_v47, %s1948_s17  ;;  %s1452_s17 = sshll.u32 %s2036_s21, 7  ;;  %s1252_s21 = scalar_lea.sflag [#allocation5], %s2272_s16 }
 0x3c6   : > { %v781_v25 = vmul.f32 %v1677_v23, %v1669_v5  ;;  %s2404_s3 = scalar_lea.hbm %s2527_s11, %s1452_s17 }
 0x3c8   : > { %v782_v26 = vpack.c.bf16 %v781_v25, %v781_v25 }
 0x3ca   : > { %1516 = vmatmul.mubr.msk.bf16.vlgmr.msra.gmra.mrb[8].mxu0 %vm724_vm2, %v782_v26 }
 0x3cb   : > { %1526 = vmatpush3.bf16.msra.mxu0 %v902_v27  ;;  %1527 = vmatprep.mubr.msk.bf16.mxu0 %vm1947_vm0, %v1946_v0 }
 0x3cc   : > { %1537 = vmatprep.subr.bf16.mxu0 %v1946_v0 }
 0x42c   : > { %v891_v28 = vpop.xlane.xlu0 %890 }
 0x42d   : > { %1678 = vrcp.f32 %v891_v28 }
 0x434   : > { %v1008_v29 = vpop.xlane.xlu1 %1007 }
 0x435   : > { %1680 = vrcp.f32 %v1008_v29 }
 0x437   : > { %v1679_v30 = vpop.eup %1678 }
 0x438   : > { %v893_v31 = vmul.f32 %v1679_v30, %v1671_v13  ;;  %v1129_v38 = vpop.permute.xlu1 %1128 }
 0x439   : > { %v1134_v40 = vsel %vm786_vm3, %v1129_v38, 0 }
 0x43a   : > { %v894_v32 = vpack.c.bf16 %v893_v31, %v893_v31 }
 0x43c   : > { %v1124_v33 = vpop.xlane.xlu0 %1123  ;;  %1528 = vmatmul.mubr.msk.bf16.vlgmr.msra.gmra.mrb[12].mxu0 %vm724_vm2, %v894_v32 }
 0x43d   : > { %1682 = vrcp.f32 %v1124_v33  ;;  %1539 = vmatprep.mubr.msk.bf16.mxu0 %vm1947_vm0, %v1946_v0 }
 0x43f   : > { %v1681_v34 = vpop.eup %1680 }
 0x440   : > { %v1010_v35 = vmul.f32 %v1681_v34, %v1673_v18  ;;  %v1013_v36 = vpop.permute.xlu0 %1012 }
 0x441   : > { %v1018_v37 = vsel %vm786_vm3, %v1013_v36, 0 }
 0x442   : > { %1538 = vmatpush3.bf16.msra.mxu0 %v1018_v37  ;;  %v1011_v39 = vpack.c.bf16 %v1010_v35, %v1010_v35 }
 0x443   : > { %1549 = vmatprep.subr.bf16.mxu0 %v1946_v0 }
 0x445   : > { %1540 = vmatmul.mubr.msk.bf16.vlgmr.msra.gmra.mrb[16].mxu0 %vm724_vm2, %v1011_v39 }
 0x446   : > { %1550 = vmatpush3.bf16.msra.mxu0 %v1134_v40  ;;  %1551 = vmatprep.mubr.msk.bf16.mxu0 %vm1947_vm0, %v1946_v0 }
 0x447   : > { %v1683_v41 = vpop.eup %1682 }
 0x448   : > { %v1126_v42 = vmul.f32 %v1683_v41, %v1675_v20 }
 0x44a   : > { %v1127_v43 = vpack.c.bf16 %v1126_v42, %v1126_v42 }
 0x44d   : > { %1552 = vmatmul.mubr.msk.bf16.vlgmr.msra.gmra.mrb[20].mxu0 %vm724_vm2, %v1127_v43 }
 0x49d   : > { %v824_v44 = vpop.f32.mrb[8].mxu0 }
 0x49e   : > { %830 = vst.msk [vmem:[#allocation2] sm:$0xff] %vm724_vm2, %v824_v44  ;;  %v1517_v45 = vpop.f32.mrb[9].mxu0 }
 0x49f   : > { %v827_v46 = vpop.f32.mrb[10].mxu0 }
 0x4a0   : > { %v1518_v47 = vpop.f32.mrb[11].mxu0 }
 0x50f   : > { %v938_v48 = vpop.f32.mrb[12].mxu0 }
 0x510   : > { %945 = vrot.lane.b32.xlu1 %v938_v48, %s1951_s28  ;;  %v1529_v49 = vpop.f32.mrb[13].mxu0  ;;  %s1954_s28 = smov [#allocation14]  }
 0x511   : > { %v941_v50 = vpop.f32.mrb[14].mxu0  ;;  %s1862_s1 = sshll.u32 %s1954_s28, 4  ;;  %s1863_s1 = int_to_ptr.vmem [resolvable:$false] %s1862_s1 }
 0x512   : > { %v1530_v51 = vpop.f32.mrb[15].mxu0  ;;  %s1864_s9 = scalar_lea.vmem %s1863_s1, 256  ;;  %p1865_p13 = scmp.lt.s32.totalorder %s2406_s20, %s1863_s1 }
 0x513   : > { %p1866_p7 = scmp.lt.s32.totalorder %s1864_s9, %s1858_s29 }
 0x515   : > { %p1867_p3 = por %p1866_p7, %p1865_p13 }
 0x517   : > { %p1868_p5 = pnand %p1867_p3, %p1861_p9 }
 0x518   : > { %v1054_v54 = vpop.f32.mrb[16].mxu0 }
 0x519   : > { %1061 = vrot.lane.b32.xlu0 %v1054_v54, %s1952_s27  ;;  %v1541_v55 = vpop.f32.mrb[17].mxu0 }
 0x51a   : > { %v1057_v56 = vpop.f32.mrb[18].mxu0 }
 0x51b   : > { %v1542_v57 = vpop.f32.mrb[19].mxu0 }
 0x520   : > { %v1170_v58 = vpop.f32.mrb[20].mxu0 }
 0x521   : > { %1177 = vrot.lane.b32.xlu1 %v1170_v58, %s1953_s30  ;;  %v1553_v59 = vpop.f32.mrb[21].mxu0 }
 0x522   : > { %v1173_v60 = vpop.f32.mrb[22].mxu0 }
 0x523   : > { %v1554_v61 = vpop.f32.mrb[23].mxu0 }
 0x582   : > { %v946_v62 = vpop.permute.xlu1 %945 }
 0x583   : > { %949 = vst.msk [vmem:[#allocation2] sm:$0xff] %vm948_vm4, %v946_v62 }
 0x58b   : > { %v1062_v0 = vpop.permute.xlu0 %1061 }
 0x58c   : > { %1065 = vst.msk [vmem:[#allocation2] sm:$0xff] %vm1064_vm5, %v1062_v0 }
 0x593   : > { %v1178_v63 = vpop.permute.xlu1 %1177 }
 0x594   : > { %1181 = vst.msk [vmem:[#allocation2] sm:$0xff] %vm1180_vm6, %v1178_v63 }
 0x59b   : > { %v1182_v1 = vld [vmem:[#allocation2] sm:$0xff] }
 0x59c   : > { %v1183_v2 = vpack.c.bf16 %v1182_v1, %v1182_v1 }
 0x59e   : > { %1560 = vmatmul.mubr.msk.bf16.vlgmr.msra.gmra.mrb[20].mxu1 %vm545_vm1, %v1183_v2 }
 0x671   : > { %v1244_v4 = vpop.f32.mrb[20].mxu1 }
 0x672   : > { %v1245_v5 = vadd.f32 %v1447_v3, %v1244_v4  ;;  %v1561_v6 = vpop.f32.mrb[21].mxu1 }
 0x673   : > { %v1247_v7 = vpop.f32.mrb[22].mxu1 }
 0x674   : > { %v1562_v8 = vpop.f32.mrb[23].mxu1  ;;  %1250 = vst.msk [vmem:[%s514_s5] sm:$0xff] %vm545_vm1, %v1245_v5 }
 0x675   : > { %1871 = shalt.err (!%p1868_p5)
}
 0x676   : > { %s1872_s16 = scalar_lea.hbm %s2404_s3, 128  ;;  %s1876_s27 = scalar_lea.hbm %s2527_s11, 256 }
 0x677   : > { %p1873_p2 = scmp.ne.s32.totalorder %s2404_s3, %s1872_s16  ;;  %p1877_p12 = scmp.lt.u32.totalorder %s2404_s3, %s2527_s11 }
 0x678   : > { %p1878_p1 = scmp.lt.u32.totalorder %s1876_s27, %s1872_s16  ;;  %p1880_p10 = scmp.lt.u32.totalorder %s1872_s16, %s2404_s3 }
 0x679   : > { %p1874_p8 = pnand %p1873_p2, %p2528_p0 }
 0x67a   : > { %p1879_p6 = por %p1878_p1, %p1877_p12 }
 0x67b   : > { %p1875_p11 = pneg %p1874_p8 }
 0x67c   : > { %p1881_p4 = por %p1880_p10, %p1879_p6 }
 0x67e   : > { %p1882_p9 = pnand %p1881_p4, %p1875_p11 }
 0x680   : > { %1885 = shalt.err (!%p1882_p9)
}
 0x681   : > { %1581 = dma.vmem_to_hbm [thread:$0]  (%p2528_p0), %s2406_s20, 128, %s2404_s3, %s1252_s21  }
 0x682 PF: > { %s2529_s12 = sld [smem:[#allocation20_spill]]  ;;  %s2530_s24 = sld [smem:[#allocation22_spill]] }
 0x683   : > { %s2531_s17 = sld [smem:[#allocation21_spill]] }
 0x688   : > { %s1277_s5 = sand.u32 1, %s2529_s12   ;;  %p2532_p13 = scmp.ne.s32.totalorder %s2530_s24, 0 }
 0x689   : > { %p2533_p7 = scmp.ge.s32.totalorder %s2531_s17, 2  ;;  %s1278_s10 = scalar_lea.sflag [#allocation5], %s1277_s5 }
 0x68b   : > { %p1604_p3 = pnand %p2533_p7, %p2532_p13 }
 0x68d   : > { %1919 = dma.done.wait (!%p1604_p3), %s1278_s10, 128  }
 0x68e   : > { %1921 = vsyncadd (!%p1604_p3), %s1278_s10, 4294967168  ;;  %s2534_s20 = sld [smem:[#allocation23_spill]]  ;;  %s2535_s15 = sld [smem:[#allocation24_spill]] }
 0x68f   : > { %s2536_s17 = smov %s1928_s18  ;;  %s2537_s18 = smov %s1932_s19 }
 0x694   : > { %p29_p5 = scmp.ge.s32.totalorder %s2534_s20, 4   ;;  %s2538_s19 = smov %s2535_s15 }
 0x696   :  { %31 = sbr.rel (!%p29_p5) target bundleno = 16 (0x10), region = 145 }
 0x69d   :  { %1283 = vsyncpa [#allocation4], 1 }
 0x69e   :  { %1285 = vsyncpa [#allocation4 + $0x1], 1 }
 0x69f   :  { %1286 = vsyncpa [#allocation7], 1 }
 0x6a0   :  { %1288 = vsyncpa [#allocation7 + $0x1], 1 }
 0x6a1   :  { %1289 = vsyncpa [#allocation10], 1 }
 0x6a2   :  { %1290 = vsyncpa [#allocation13], 1 }
 0x6a3   :  { %1291 = vsyncpa [#allocation5], 1 }
 0x6a4   :  { %1293 = vsyncpa [#allocation5 + $0x1], 1 }

</bundles_post_ra>
